<compile_context>
chip_gen: v6e
topology: v6e:2x2x1
jax: 0.10.0
libtpu: 0.0.40
codegen_flags: <defaults>
</compile_context>

<pallas_src>
import jax
import jax.numpy as jnp
from jax.experimental import pallas as pl
from jax.experimental.pallas import tpu as pltpu


def _cdiv(a, b):
    return -(-a // b)


def _round_up(a, m):
    return _cdiv(a, m) * m


def _vmem_capacity_bytes(default=64 * 1024 * 1024):
    """Physical per-TensorCore VMEM; conservative (v7x) default if unknown."""
    try:
        return int(pltpu.get_tpu_info().vmem_capacity_bytes)
    except Exception:
        return default


def _featuremap_kernel(x_ref, w_ref, b_ref, o_ref):
    """One (batch, spatial-tile) block of the 1x1-conv-as-matmul.

    x_ref: (C_in,  T)     input pixels: channels on sublanes, spatial on lanes
    w_ref: (C_out, C_in)  weight (resident: constant index_map)
    b_ref: (C_out, 1)     bias   (resident: constant index_map)
    o_ref: (C_out, T)     output tile (lane-dense)
    """
    acc = jnp.dot(w_ref[...], x_ref[...], preferred_element_type=jnp.float32)
    o_ref[...] = (acc + b_ref[...]).astype(o_ref.dtype)


def _pick_spatial_tile(c_in, c_out, vmem_budget):
    """Lane tile (multiple of 128) targeting >=~4 MiB of HBM traffic per grid
    step, capped so the double-buffered x/out tiles plus the resident weight
    stay inside `vmem_budget`."""
    bytes_per_col = 4 * (c_in + c_out)              # one f32 x column + out column
    weight_bytes = 4 * c_out * c_in
    tile_budget = vmem_budget - 2 * weight_bytes - (1 << 20)   # weight + slack
    tile_budget = max(tile_budget, 2 * 128 * bytes_per_col)
    t_vmem_cap = max(128, (tile_budget // (2 * bytes_per_col)) // 128 * 128)
    t_target = max(128, _round_up(_cdiv(4 << 20, bytes_per_col), 128))
    return min(t_target, t_vmem_cap)


def feature_map_pallas(x_nchw, weight, bias):
    """1x1 Conv2d (stride 1) via a per-batch Pallas matmul kernel.

    x_nchw : (N, C_in, H, W)  float32
    weight : (C_out, C_in)    float32  (the (1,1) kernel dims squeezed out)
    bias   : (C_out,)         float32
    returns: (N, C_out, H, W) float32
    """
    N, C_in, H, W = x_nchw.shape
    C_out = weight.shape[0]
    HW = H * W

    # ---- tiling / VMEM plan (all static Python math) ----------------------
    vmem_phys = _vmem_capacity_bytes()
    # Keep the working set around ~60% of physical VMEM (~38 MiB on a v7x TC,
    # ~76 MiB on v5e/v6e) to leave headroom for compiler scratch.
    working_budget = (vmem_phys * 6) // 10
    t = _pick_spatial_tile(C_in, C_out, working_budget)

    if HW <= t:
        # Whole spatial row in one tile: exact block dims, zero masking.
        t = HW
    n_tiles = _cdiv(HW, t)

    # v7x has 2 TensorCores: keep >=2 grid steps whenever the shape allows.
    if N * n_tiles < 2 and HW > 128:
        t = max(128, _round_up(_cdiv(HW, 2), 128))
        n_tiles = _cdiv(HW, t)

    weight_bytes = 4 * C_out * C_in
    # Single-buffer the resident operands once the second pipeline buffer of
    # the weight would cost real VMEM (>=1 MiB); pointless for tiny weights.
    single_buffer_resident = weight_bytes >= (1 << 20)

    need = (2 * 4 * C_in * t            # double-buffered x tile
            + 2 * 4 * C_out * t         # double-buffered out tile
            + 2 * weight_bytes          # weight (worst case: 2 buffers)
            + 2 * 4 * C_out             # bias
            + (2 << 20))                # slack for compiler internals
    vmem_limit = int(min(max(2 * need, 16 << 20), (vmem_phys * 3) // 4))

    # ---- launch ------------------------------------------------------------
    x3d = x_nchw.reshape(N, C_in, HW)   # contiguous -> free reshape, no transpose
    b2d = bias.reshape(C_out, 1)        # broadcasts over the lane (spatial) axis

    def _resident_spec(shape):
        if single_buffer_resident:
            return pl.BlockSpec(shape, lambda n, j: (0,) * len(shape),
                                pipeline_mode=pl.Buffered(1))
        return pl.BlockSpec(shape, lambda n, j: (0,) * len(shape))

    cost = pl.CostEstimate(
        flops=2 * N * C_out * C_in * HW,
        transcendentals=0,
        bytes_accessed=4 * (N * C_in * HW + N * C_out * HW + C_out * C_in + C_out),
    )

    out3d = pl.pallas_call(
        _featuremap_kernel,
        out_shape=jax.ShapeDtypeStruct((N, C_out, HW), x_nchw.dtype),
        grid_spec=pltpu.PrefetchScalarGridSpec(
            num_scalar_prefetch=0,
            grid=(N, n_tiles),
            in_specs=[
                # batch dim squeezed out of the kernel view -> (C_in, t)
                pl.BlockSpec((None, C_in, t), lambda n, j: (n, 0, j)),
                _resident_spec((C_out, C_in)),   # weight, resident
                _resident_spec((C_out, 1)),      # bias,   resident
            ],
            out_specs=pl.BlockSpec((None, C_out, t), lambda n, j: (n, 0, j)),
        ),
        compiler_params=pltpu.CompilerParams(
            # independent output tiles on both grid axes -> megacore shardable
            dimension_semantics=("parallel", "parallel"),
            vmem_limit_bytes=vmem_limit,
        ),
        cost_estimate=cost,
    )(x3d, weight, b2d)

    return out3d.reshape(N, C_out, H, W)


def init_params(key, input_n, output_n):
    """Deterministic init mimicking nn.Conv2d defaults (kaiming-uniform bounds)."""
    kw, kb = jax.random.split(key)
    fan_in = input_n * 1 * 1
    bound = 1.0 / jnp.sqrt(fan_in)
    weight = jax.random.uniform(
        kw, (output_n, input_n), jnp.float32, minval=-bound, maxval=bound
    )
    bias = jax.random.uniform(
        kb, (output_n,), jnp.float32, minval=-bound, maxval=bound
    )
    return weight, bias


if __name__ == "__main__":
    key = jax.random.PRNGKey(0)
    k_x, k_p = jax.random.split(key)

    N, C_in, H, W = 2, 4, 16, 16
    C_out = 8

    x = jax.random.normal(k_x, (N, C_in, H, W), dtype=jnp.float32)
    weight, bias = init_params(k_p, C_in, C_out)

    fn = jax.jit(feature_map_pallas)
    out = jax.block_until_ready(fn(x, weight, bias))

    # Reference check (plain JAX einsum = 1x1 conv semantics).
    ref = jnp.einsum("nchw,oc->nohw", x, weight) + bias[None, :, None, None]
    assert out.shape == (N, C_out, H, W)
    assert jnp.allclose(out, ref, atol=1e-5, rtol=1e-5)

    print("KERNEL_OK")
</pallas_src>

<mosaic_0001>
module attributes {stable_mosaic.version = 11 : i64} {
  func.func @_featuremap_kernel(%arg0: i32, %arg1: i32, %arg2: memref<1x4x256xf32, #tpu.memory_space<vmem>>, %arg3: memref<8x4xf32, #tpu.memory_space<vmem>>, %arg4: memref<8x1xf32, #tpu.memory_space<vmem>>, %arg5: memref<1x8x256xf32, #tpu.memory_space<vmem>>) attributes {dimension_semantics = [#tpu.dimension_semantics<parallel>, #tpu.dimension_semantics<parallel>], iteration_bounds = array<i64: 2, 1>, scalar_prefetch = 0 : i64, scratch_operands = 0 : i64, tpu.core_type = #tpu.core_type<tc>, window_params = [{transform_indices = @transform_0, window_bounds = array<i64: 1, 4, 256>}, {pipeline_mode = #tpu.pipeline_mode<synchronous>, transform_indices = @transform_1, window_bounds = array<i64: 8, 4>}, {pipeline_mode = #tpu.pipeline_mode<synchronous>, transform_indices = @transform_2, window_bounds = array<i64: 8, 1>}, {transform_indices = @transform_3, window_bounds = array<i64: 1, 8, 256>}]} {
    %c0 = arith.constant 0 : index
    %c0_0 = arith.constant 0 : index
    %0 = vector.load %arg3[%c0, %c0_0] : memref<8x4xf32, #tpu.memory_space<vmem>>, vector<8x4xf32>
    %c0_1 = arith.constant 0 : index
    %c0_2 = arith.constant 0 : index
    %c0_3 = arith.constant 0 : index
    %1 = vector.load %arg2[%c0_1, %c0_2, %c0_3] : memref<1x4x256xf32, #tpu.memory_space<vmem>>, vector<1x4x256xf32>
    %2 = vector.shape_cast %1 : vector<1x4x256xf32> to vector<4x256xf32>
    %cst = arith.constant dense<0.000000e+00> : vector<8x256xf32>
    %3 = tpu.matmul %0, %2, %cst {dimension_numbers = #tpu.dot_dimension_numbers<[1], [0], [0], [1], [0, 0, 1, 1], [], []>} : vector<8x4xf32>, vector<4x256xf32>, vector<8x256xf32> -> vector<8x256xf32>
    %c0_4 = arith.constant 0 : index
    %c0_5 = arith.constant 0 : index
    %4 = vector.load %arg4[%c0_4, %c0_5] : memref<8x1xf32, #tpu.memory_space<vmem>>, vector<8x1xf32>
    %5 = vector.broadcast %4 : vector<8x1xf32> to vector<8x256xf32>
    %6 = arith.addf %3, %5 : vector<8x256xf32>
    %c0_6 = arith.constant 0 : index
    %c0_7 = arith.constant 0 : index
    %c0_8 = arith.constant 0 : index
    %7 = vector.load %arg5[%c0_6, %c0_7, %c0_8] : memref<1x8x256xf32, #tpu.memory_space<vmem>>, vector<1x8x256xf32>
    %8 = vector.shape_cast %7 : vector<1x8x256xf32> to vector<8x256xf32>
    %9 = vector.shape_cast %6 : vector<8x256xf32> to vector<1x8x256xf32>
    tpu.vector_store %arg5[%c0_6, %c0_7, %c0_8], %9 {strides = array<i32>} : memref<1x8x256xf32, #tpu.memory_space<vmem>>, vector<1x8x256xf32>,
    return
  }
  func.func @transform_0(%arg0: i32, %arg1: i32) -> (i32, i32, i32) {
    %c0_i32 = arith.constant 0 : i32
    %c0_i32_0 = arith.constant 0 : i32
    return %arg0, %c0_i32, %arg1 : i32, i32, i32
  }
  func.func @transform_1(%arg0: i32, %arg1: i32) -> (i32, i32) {
    %c0_i32 = arith.constant 0 : i32
    %c0_i32_0 = arith.constant 0 : i32
    %c0_i32_1 = arith.constant 0 : i32
    return %c0_i32, %c0_i32_0 : i32, i32
  }
  func.func @transform_2(%arg0: i32, %arg1: i32) -> (i32, i32) {
    %c0_i32 = arith.constant 0 : i32
    %c0_i32_0 = arith.constant 0 : i32
    %c0_i32_1 = arith.constant 0 : i32
    return %c0_i32, %c0_i32_0 : i32, i32
  }
  func.func @transform_3(%arg0: i32, %arg1: i32) -> (i32, i32, i32) {
    %c0_i32 = arith.constant 0 : i32
    %c0_i32_0 = arith.constant 0 : i32
    return %arg0, %c0_i32, %arg1 : i32, i32, i32
  }
}

</mosaic_0001>

<bundles_post_ra>
// kernel: feature_map_pallas.1
= control target key start
LH: loop header
LB: loop body
LE: loop exit
PB: predicated region body
PF: predicated region fallthrough
CT: control target
= control target key end

     0   :  { %s479_s12 = smov 0   ;;  %s481_s13 = smov 0   ;;  %s518_s0 = inlined_call_operand.vmem [shape: f32[2,4,256], index: 0, kind: input, shape index: {}]   ;;  %s519_s1 = inlined_call_operand.vmem [shape: f32[8,4], index: 1, kind: input, shape index: {}]   ;;  %s520_s2 = inlined_call_operand.vmem [shape: f32[8,1], index: 2, kind: input, shape index: {}]   ;;  %s521_s3 = inlined_call_operand.vmem [shape: f32[2,8,256], index: 3, kind: output, shape index: {}]  }
   0x1   :  { %s483_s14 = smov 0  }
   0x2 LB: > { %s25_s15 = sadd.s32 1, %s451_s13  ;;  %p393_p0 = scmp.ge.s32.totalorder %s455_s14, 1  ;;  %s455_s14 = sphi %s483_s14, %s13_s14   ;;  %s451_s13 = sphi %s481_s13, %s523_s13   ;;  %s447_s12 = sphi %s479_s12, %s522_s12  }
   0x3   : > { %p27_p1 = scmp.ge.s32.totalorder %s25_s15, 2  ;;  %p158_p2 = scmp.lt.s32.totalorder %s455_s14, 3 }
   0x5   : > { %s525_s15 = smov (%p27_p1, %s25_s15), 0  ;;  %p159_p3 = pnand %p393_p0, %p158_p2 }
   0x6   : > { %p191_p4 = scmp.lt.s32.totalorder (!%p159_p3), %s447_s12, 1 }
   0x7   : > { %162 = sbr.rel (%p159_p3) target bundleno = 218 (0xda), region = 32 }
   0xc   : > { %v457_v0 = vmov 0.0   ;;  %v458_v1 = vmov 0   ;;  %v212_v2 = vld [vmem:[%s520_s2] sm:$0xff]  ;;  %s527_s12 = smov (!%p191_p4, %s447_s12), 1  ;;  %vm224_vm0 = vcmask 1043456   ;;  %vm220_vm1 = vcmask 31744  }
   0xd   : > { %293 = vmatprep.mubr.f32.mxu0 %v457_v0  ;;  %431 = vset.pattern.permute.xlu0 %v458_v1  ;;  %s403_s18 = sshll.u32 %s527_s12, 3  ;;  %v210_v5 = vld [vmem:[%s519_s1] sm:$0xff]  ;;  %s404_s24 = sshll.u32 %s527_s12, 4 }
   0xe   : > { %215 = vperm.xlu0 %431, %v212_v2   ;;  %s198_s21 = scalar_lea.vmem %s518_s0, %s403_s18  ;;  %s208_s27 = scalar_lea.vmem %s521_s3, %s404_s24 }
   0xf   : > { %v211_v3 = vld [vmem:[%s198_s21] sm:$0xff] }
  0x10   : > { %v219_v4 = vcombine.high %v211_v3, %v211_v3 }
  0x12   : > { %398 = vmatprep.subr.msk.mxu0 %vm224_vm0, %v219_v4 }
  0x13   : > { %399 = vmatpush1.msk.msra.mxu0 %vm224_vm0, %v211_v3 }
  0x14   : > { %400 = vmatmul.mubr.msk.f32.vlgmr.msra.gmra.mxu0 %vm220_vm1, %v210_v5 }
  0x89   : > { %v216_v6 = vpop.permute.xlu0 %215 }
  0xd4   : > { %v295_v7 = vpop.f32.mrf.mxu0 }
  0xd5   : > { %v296_v8 = vadd.f32 %v295_v7, %v216_v6 }
  0xd6   : > { %v297_v9 = vpop.f32.mrf.mxu0 }
  0xd7   : > { %300 = vst [vmem:[%s208_s27] sm:$0xff] %v296_v8  ;;  %v298_v10 = vadd.f32 %v297_v9, %v216_v6 }
  0xd9   : > { %301 = vst [vmem:[%s208_s27 + $0x8] sm:$0xff] %v298_v10 }
  0xda PF: > { %s13_s14 = sadd.s32 1, %s455_s14   ;;  %s522_s12 = smov %s451_s13 }
  0xdb   : > { %p10_p5 = scmp.ge.s32.totalorder %s13_s14, 4   ;;  %s523_s13 = smov %s525_s15 }
  0xdd   :  { %12 = sbr.rel (!%p10_p5) target bundleno = 2 (0x2), region = 62 }

</bundles_post_ra>
